<compile_context>
chip_gen: v5e
topology: v5e:2x2
jax: 0.10.0
libtpu: 0.0.40
codegen_flags: <defaults>
</compile_context>

<pallas_src>
import functools

import jax
import jax.numpy as jnp
import numpy as np
from jax.experimental import pallas as pl
from jax.experimental.pallas import tpu as pltpu

_LANE = 128


def _round_up(x, m):
    return ((x + m - 1) // m) * m


# --------------------------- init-time weight prep ---------------------------

def prepare_params(params, board_shape, piece_dim):
    """Compose conv1..conv3 + fc1 + fc2 into one padded affine map (hoisted)."""
    height, width = board_shape
    hp = jax.lax.Precision.HIGHEST
    dn = ("NCHW", "OIHW", "NCHW")

    def conv_stack(x):                      # x: (N, 1, H, W) f32
        for wk, bk in (("w1c", "b1c"), ("w2c", "b2c"), ("w3c", "b3c")):
            x = jax.lax.conv_general_dilated(
                x, params[wk], (1, 1), "VALID", dimension_numbers=dn,
                precision=hp)
            x = x + params[bk][None, :, None, None]
        return x

    # The conv stack is affine in the board: feat = board_flat @ A + c_bias,
    # flattened in torch's nn.Flatten (c, y, x) order.
    n_board = height * width
    basis = jnp.eye(n_board, dtype=jnp.float32).reshape(n_board, 1, height, width)
    c_bias = conv_stack(jnp.zeros((1, 1, height, width), jnp.float32)).reshape(-1)
    A = conv_stack(basis).reshape(n_board, -1) - c_bias[None, :]   # (H*W, 336)
    flat = c_bias.shape[0]

    w_fc1 = jnp.asarray(params["w_fc1"], jnp.float32)              # (2048, 433)
    b_fc1 = jnp.asarray(params["b_fc1"], jnp.float32)
    w_fc2 = jnp.asarray(params["w_fc2"], jnp.float32)              # (6, 2048)
    b_fc2 = jnp.asarray(params["b_fc2"], jnp.float32)
    assert w_fc1.shape[1] == flat + piece_dim

    w1c, w1p = w_fc1[:, :flat], w_fc1[:, flat:]
    m = jnp.dot(w1c.T, w_fc2.T, precision=hp)                      # (336, 6)
    w_board = jnp.dot(A, m, precision=hp)                          # (H*W, 6)
    w_piece = jnp.dot(w1p.T, w_fc2.T, precision=hp)                # (P, 6)
    b_total = (jnp.dot(jnp.dot(c_bias, w1c.T, precision=hp) + b_fc1,
                       w_fc2.T, precision=hp) + b_fc2)             # (6,)

    n_out = int(w_fc2.shape[0])
    kb_pad = _round_up(n_board, _LANE)          # 256: board segment, lane 0
    kp_pad = _round_up(piece_dim, _LANE)        # 128: piece segment, lane 256
    n_pad = _round_up(n_out, _LANE)             # 128: lane-dense output

    w_total = np.zeros((kb_pad + kp_pad, n_pad), np.float32)
    w_total[:n_board, :n_out] = np.asarray(w_board)
    w_total[kb_pad:kb_pad + piece_dim, :n_out] = np.asarray(w_piece)
    bias = np.zeros((1, n_pad), np.float32)
    bias[0, :n_out] = np.asarray(b_total)

    return {"w_total": jnp.asarray(w_total, jnp.float32),
            "b_total": jnp.asarray(bias, jnp.float32)}


# --------------------------------- kernel -----------------------------------

def _dqn_kernel(board_ref, piece_ref, w_ref, b_ref, o_ref, x_ref,
                *, kb, kb_pad, kp):
    # Build the joined input [board_flat | 0 | piece | 0] in VMEM; both live
    # segments start at 128-aligned lane offsets (0 and kb_pad) so the stores
    # need no lane rotation, and the zeroed pad lanes make the padded K exact.
    x_ref[...] = jnp.zeros(x_ref.shape, x_ref.dtype)
    x_ref[:, :kb] = board_ref[...]
    x_ref[:, kb_pad:kb_pad + kp] = piece_ref[...]
    # One batch-stacked MXU GEMM == conv1..conv3 -> flatten/concat -> fc1 -> fc2
    # (the reference DQN has no nonlinearity anywhere, so this is exact).
    o_ref[...] = (jnp.dot(x_ref[...], w_ref[...],
                          preferred_element_type=jnp.float32) + b_ref[...])


# ------------------------------ forward wrapper ------------------------------

def dqn_forward(prep, board, piece, *, n_out=6):
    """Batched DQN forward: board (B, H, W) f32, piece (B, P) f32 -> (B, 6)."""
    batch, height, width = board.shape
    kb = height * width
    kp = piece.shape[1]
    kb_pad = _round_up(kb, _LANE)
    k_pad, n_pad = prep["w_total"].shape
    assert k_pad == kb_pad + _round_up(kp, _LANE)

    # Free bitcast reshape; no per-call pad/concat ops on the host.
    board2d = board.reshape(batch, kb).astype(jnp.float32)
    piece2d = piece.astype(jnp.float32)

    kernel = functools.partial(_dqn_kernel, kb=kb, kb_pad=kb_pad, kp=kp)
    out = pl.pallas_call(
        kernel,
        out_shape=jax.ShapeDtypeStruct((batch, n_pad), jnp.float32),
        in_specs=[pl.BlockSpec(memory_space=pltpu.MemorySpace.VMEM)] * 4,
        out_specs=pl.BlockSpec(memory_space=pltpu.MemorySpace.VMEM),
        scratch_shapes=[pltpu.VMEM((batch, k_pad), jnp.float32)],
    )(board2d, piece2d, prep["w_total"], prep["b_total"])
    return out[:, :n_out]


# ------------------------------ init & reference -----------------------------

def init_params(key):
    # Deterministic init mimicking torch's default U(-1/sqrt(fan_in), ...).
    def uinit(k, shape, fan_in):
        bound = 1.0 / jnp.sqrt(jnp.float32(fan_in))
        return jax.random.uniform(k, shape, jnp.float32, -bound, bound)

    ks = jax.random.split(key, 10)
    return {
        "w1c": uinit(ks[0], (16, 1, 3, 3), 1 * 9),   "b1c": uinit(ks[1], (16,), 1 * 9),
        "w2c": uinit(ks[2], (32, 16, 3, 3), 16 * 9), "b2c": uinit(ks[3], (32,), 16 * 9),
        "w3c": uinit(ks[4], (6, 32, 3, 3), 32 * 9),  "b3c": uinit(ks[5], (6,), 32 * 9),
        "w_fc1": uinit(ks[6], (2048, 433), 433),     "b_fc1": uinit(ks[7], (2048,), 433),
        "w_fc2": uinit(ks[8], (6, 2048), 2048),      "b_fc2": uinit(ks[9], (6,), 2048),
    }


def dqn_reference(params, board, piece):
    # Pure-JAX f32 reference of the PyTorch module's batched branch.
    hp = jax.lax.Precision.HIGHEST
    dn = ("NCHW", "OIHW", "NCHW")
    x = board[:, None, :, :].astype(jnp.float32)
    for wk, bk in (("w1c", "b1c"), ("w2c", "b2c"), ("w3c", "b3c")):
        x = jax.lax.conv_general_dilated(x, params[wk], (1, 1), "VALID",
                                         dimension_numbers=dn, precision=hp)
        x = x + params[bk][None, :, None, None]
    emb = x.reshape(x.shape[0], -1)
    joined = jnp.concatenate([emb, piece.astype(jnp.float32)], axis=1)
    h = jnp.dot(joined, params["w_fc1"].T, precision=hp) + params["b_fc1"]
    return jnp.dot(h, params["w_fc2"].T, precision=hp) + params["b_fc2"]


# ----------------------------------- main ------------------------------------

if __name__ == "__main__":
    # TODO(synk): the scalar-piece branch (`type(piece) == int`), flt_totns()
    # and the debug print/exit are host-side Python plumbing, not kernel work;
    # only the batched tensor path is implemented here.
    key = jax.random.PRNGKey(0)
    k_params, k_board, k_piece = jax.random.split(key, 3)

    B, H, W = 2, 20, 10                       # Tetris-style board
    P = 433 - 6 * (H - 6) * (W - 6)           # = 97, so fc1 input dim is 433

    params = init_params(k_params)
    prep = prepare_params(params, (H, W), P)  # one-time, hoisted out of forward

    board = jax.random.uniform(k_board, (B, H, W), jnp.float32)
    piece = jax.random.uniform(k_piece, (B, P), jnp.float32)

    fwd = jax.jit(dqn_forward)
    out = jax.block_until_ready(fwd(prep, board, piece))
    assert out.shape == (B, 6) and out.dtype == jnp.float32

    ref = dqn_reference(params, board, piece)
    assert jnp.allclose(out, ref, atol=1e-2, rtol=1e-2), (out, ref)

    print("KERNEL_OK")
</pallas_src>

<mosaic_0001>
module attributes {stable_mosaic.version = 11 : i64} {
  func.func @_dqn_kernel(%arg0: memref<2x200xf32, #tpu.memory_space<vmem>>, %arg1: memref<2x97xf32, #tpu.memory_space<vmem>>, %arg2: memref<384x128xf32, #tpu.memory_space<vmem>>, %arg3: memref<1x128xf32, #tpu.memory_space<vmem>>, %arg4: memref<2x128xf32, #tpu.memory_space<vmem>>, %arg5: memref<2x384xf32, #tpu.memory_space<vmem>>) attributes {dimension_semantics = [], scalar_prefetch = 0 : i64, scratch_operands = 1 : i64, tpu.core_type = #tpu.core_type<tc>} {
    %cst = arith.constant 0.000000e+00 : f32
    %0 = vector.broadcast %cst : f32 to vector<2x384xf32>
    %c0 = arith.constant 0 : index
    %c0_0 = arith.constant 0 : index
    %1 = vector.load %arg5[%c0, %c0_0] : memref<2x384xf32, #tpu.memory_space<vmem>>, vector<2x384xf32>
    tpu.vector_store %arg5[%c0, %c0_0], %0 {strides = array<i32>} : memref<2x384xf32, #tpu.memory_space<vmem>>, vector<2x384xf32>,
    %c0_1 = arith.constant 0 : index
    %c0_2 = arith.constant 0 : index
    %2 = vector.load %arg0[%c0_1, %c0_2] : memref<2x200xf32, #tpu.memory_space<vmem>>, vector<2x200xf32>
    %c0_3 = arith.constant 0 : index
    %c0_4 = arith.constant 0 : index
    %3 = vector.load %arg5[%c0_3, %c0_4] : memref<2x384xf32, #tpu.memory_space<vmem>>, vector<2x200xf32>
    tpu.vector_store %arg5[%c0_3, %c0_4], %2 {strides = array<i32>} : memref<2x384xf32, #tpu.memory_space<vmem>>, vector<2x200xf32>,
    %c0_5 = arith.constant 0 : index
    %c0_6 = arith.constant 0 : index
    %4 = vector.load %arg1[%c0_5, %c0_6] : memref<2x97xf32, #tpu.memory_space<vmem>>, vector<2x97xf32>
    %c0_7 = arith.constant 0 : index
    %c256 = arith.constant 256 : index
    %5 = vector.load %arg5[%c0_7, %c256] : memref<2x384xf32, #tpu.memory_space<vmem>>, vector<2x97xf32>
    tpu.vector_store %arg5[%c0_7, %c256], %4 {strides = array<i32>} : memref<2x384xf32, #tpu.memory_space<vmem>>, vector<2x97xf32>,
    %c0_8 = arith.constant 0 : index
    %c0_9 = arith.constant 0 : index
    %6 = vector.load %arg5[%c0_8, %c0_9] : memref<2x384xf32, #tpu.memory_space<vmem>>, vector<2x384xf32>
    %c0_10 = arith.constant 0 : index
    %c0_11 = arith.constant 0 : index
    %7 = vector.load %arg2[%c0_10, %c0_11] : memref<384x128xf32, #tpu.memory_space<vmem>>, vector<384x128xf32>
    %cst_12 = arith.constant dense<0.000000e+00> : vector<2x128xf32>
    %8 = tpu.matmul %6, %7, %cst_12 {dimension_numbers = #tpu.dot_dimension_numbers<[1], [0], [0], [1], [0, 0, 1, 1], [], []>} : vector<2x384xf32>, vector<384x128xf32>, vector<2x128xf32> -> vector<2x128xf32>
    %c0_13 = arith.constant 0 : index
    %c0_14 = arith.constant 0 : index
    %9 = vector.load %arg3[%c0_13, %c0_14] : memref<1x128xf32, #tpu.memory_space<vmem>>, vector<1x128xf32>
    %10 = vector.broadcast %9 : vector<1x128xf32> to vector<2x128xf32>
    %11 = arith.addf %8, %10 : vector<2x128xf32>
    %c0_15 = arith.constant 0 : index
    %c0_16 = arith.constant 0 : index
    %12 = vector.load %arg4[%c0_15, %c0_16] : memref<2x128xf32, #tpu.memory_space<vmem>>, vector<2x128xf32>
    tpu.vector_store %arg4[%c0_15, %c0_16], %11 {strides = array<i32>} : memref<2x128xf32, #tpu.memory_space<vmem>>, vector<2x128xf32>,
    return
  }
}

</mosaic_0001>

<bundles_post_ra>
// kernel: dqn_forward.1
= control target key start
LH: loop header
LB: loop body
LE: loop exit
PB: predicated region body
PF: predicated region fallthrough
CT: control target
= control target key end

     0   :  { %9 = vsyncpa [#allocation4], 0  ;;  %s285_s0 = inlined_call_operand.vmem [shape: f32[2,200], index: 0, kind: input, shape index: {}]   ;;  %s286_s1 = inlined_call_operand.vmem [shape: f32[2,97], index: 1, kind: input, shape index: {}]   ;;  %s287_s2 = inlined_call_operand.hbm [shape: f32[384,128], index: 2, kind: input, shape index: {}]   ;;  %s288_s3 = inlined_call_operand.vmem [shape: f32[1,128], index: 3, kind: input, shape index: {}]   ;;  %s289_s4 = inlined_call_operand.hbm [shape: f32[2,128], index: 4, kind: output, shape index: {}]  }
   0x1   :  { %10 = vsyncpa [#allocation5], 0  ;;  %s19_s17 = sshll.u32 %s287_s2, 4  ;;  %s240_s18 = smov [#allocation3]   ;;  %s20_s17 = int_to_ptr.hbm [resolvable:$true] %s19_s17 }
   0x2   :  { %s21_s19 = sshll.u32 %s240_s18, 4  ;;  %s241_s20 = smov 128   ;;  %s22_s19 = int_to_ptr.vmem [resolvable:$true] %s21_s19 }
   0x3   :  { %s242_s21 = smov 8  }
   0x4   :  { %27 = dma.hbm_to_vmem [thread:$0]  %s20_s17, 6144, %s22_s19, [#allocation4], %s241_s20, %s241_s20, %s242_s21  }
   0x5   :  { %236 = dma.done.wait [#allocation4], 6144  }
   0x6   :  { %237 = vsyncadd [#allocation4], 4294961152  ;;  %v243_v0 = vmov 0.0   ;;  %v91_v1 = vld [vmem:[#allocation3 + $0x178] sm:$0xff]  ;;  %v90_v3 = vld [vmem:[#allocation3 + $0x170] sm:$0xff]  ;;  %vm36_vm0 = vcmask 1041408  }
   0x7   :  { %34 = vst [vmem:[#allocation2] sm:$0x3f] %v243_v0  ;;  %v59_v2 = vld [vmem:[#allocation3 + $0x78] sm:$0xff]  ;;  %144 = vmatpush.msra.mxu2 %v91_v1  ;;  %v58_v4 = vld [vmem:[#allocation3 + $0x70] sm:$0xff]  ;;  %v89_v6 = vld [vmem:[#allocation3 + $0x168] sm:$0xff]  ;;  %vm37_vm1 = vcmask 584706  }
   0x8   :  { %104 = vmatpush.msra.mxu0 %v59_v2  ;;  %v75_v5 = vld [vmem:[#allocation3 + $0xf8] sm:$0xff]  ;;  %v57_v7 = vld [vmem:[#allocation3 + $0x68] sm:$0xff]  ;;  %v74_v8 = vld [vmem:[#allocation3 + $0xf0] sm:$0xff]  ;;  %vm41_vm3 = vcmask 787456   ;;  %s244_s25 = smov [#allocation6]   ;;  %s172_s29 = sshll.u32 %s289_s4, 4  ;;  %s173_s29 = int_to_ptr.hbm [resolvable:$true] %s172_s29 }
   0x9   :  { %124 = vmatpush.msra.mxu1 %v75_v5  ;;  %145 = vmatpush.msra.mxu2 %v90_v3  ;;  %v73_v9 = vld [vmem:[#allocation3 + $0xe8] sm:$0xff]  ;;  %v88_v10 = vld [vmem:[#allocation3 + $0x160] sm:$0xff]  ;;  %v87_v13 = vld [vmem:[#allocation3 + $0x158] sm:$0xff]  ;;  %s170_s26 = sshll.u32 %s244_s25, 4  ;;  %s171_s26 = int_to_ptr.vmem [resolvable:$true] %s170_s26 }
   0xa   :  { %105 = vmatpush.msra.mxu0 %v58_v4  ;;  %v56_v11 = vld [vmem:[#allocation3 + $0x60] sm:$0xff]  ;;  %v55_v14 = vld [vmem:[#allocation3 + $0x58] sm:$0xff]  ;;  %v86_v16 = vld [vmem:[#allocation3 + $0x150] sm:$0xff] }
   0xb   :  { %125 = vmatpush.msra.mxu1 %v74_v8  ;;  %146 = vmatpush.msra.mxu2 %v89_v6  ;;  %v72_v12 = vld [vmem:[#allocation3 + $0xe0] sm:$0xff]  ;;  %v71_v15 = vld [vmem:[#allocation3 + $0xd8] sm:$0xff]  ;;  %v54_v17 = vld [vmem:[#allocation3 + $0x50] sm:$0xff] }
   0xc   :  { %106 = vmatpush.msra.mxu0 %v57_v7  ;;  %v70_v18 = vld [vmem:[#allocation3 + $0xd0] sm:$0xff]  ;;  %v85_v19 = vld [vmem:[#allocation3 + $0x148] sm:$0xff]  ;;  %v84_v22 = vld [vmem:[#allocation3 + $0x140] sm:$0xff] }
   0xd   :  { %126 = vmatpush.msra.mxu1 %v73_v9  ;;  %147 = vmatpush.msra.mxu2 %v88_v10  ;;  %v53_v20 = vld [vmem:[#allocation3 + $0x48] sm:$0xff]  ;;  %v52_v23 = vld [vmem:[#allocation3 + $0x40] sm:$0xff]  ;;  %vm38_vm2 = vmor %vm37_vm1, %vm36_vm0 }
   0xe   :  { %107 = vmatpush.msra.mxu0 %v56_v11  ;;  %v69_v21 = vld [vmem:[#allocation3 + $0xc8] sm:$0xff]  ;;  %v68_v24 = vld [vmem:[#allocation3 + $0xc0] sm:$0xff]  ;;  %v83_v25 = vld [vmem:[#allocation3 + $0x138] sm:$0xff] }
   0xf   :  { %127 = vmatpush.msra.mxu1 %v72_v12  ;;  %148 = vmatpush.msra.mxu2 %v87_v13  ;;  %v51_v26 = vld [vmem:[#allocation3 + $0x38] sm:$0xff]  ;;  %v35_v28 = vld [vmem:[%s285_s0] sm:$0xf]  ;;  %v81_v33 = vld [vmem:[#allocation3 + $0x128] sm:$0xff] }
  0x10   :  { %108 = vmatpush.msra.mxu0 %v55_v14  ;;  %v67_v27 = vld [vmem:[#allocation3 + $0xb8] sm:$0xff]  ;;  %v40_v29 = vld [vmem:[%s286_s1] sm:$0x3]  ;;  %39 = vst.msk [vmem:[#allocation2] sm:$0xf] %vm38_vm2, %v35_v28  ;;  %v49_v34 = vld [vmem:[#allocation3 + $0x28] sm:$0xff] }
  0x11   :  { %128 = vmatpush.msra.mxu1 %v71_v15  ;;  %149 = vmatpush.msra.mxu2 %v86_v16  ;;  %v82_v30 = vld [vmem:[#allocation3 + $0x130] sm:$0xff]  ;;  %42 = vst.msk [vmem:[#allocation2 + $0x4] sm:$0x3] %vm41_vm3, %v40_v29  ;;  %v65_v35 = vld [vmem:[#allocation3 + $0xa8] sm:$0xff]  ;;  %v80_v36 = vld [vmem:[#allocation3 + $0x120] sm:$0xff] }
  0x12   :  { %109 = vmatpush.msra.mxu0 %v54_v17  ;;  %v50_v31 = vld [vmem:[#allocation3 + $0x30] sm:$0xff]  ;;  %v48_v37 = vld [vmem:[#allocation3 + $0x20] sm:$0xff]  ;;  %v79_v39 = vld [vmem:[#allocation3 + $0x118] sm:$0xff] }
  0x13   :  { %129 = vmatpush.msra.mxu1 %v70_v18  ;;  %150 = vmatpush.msra.mxu2 %v85_v19  ;;  %v66_v32 = vld [vmem:[#allocation3 + $0xb0] sm:$0xff]  ;;  %v64_v38 = vld [vmem:[#allocation3 + $0xa0] sm:$0xff]  ;;  %v47_v40 = vld [vmem:[#allocation3 + $0x18] sm:$0xff] }
  0x14   :  { %110 = vmatpush.msra.mxu0 %v53_v20  ;;  %v63_v41 = vld [vmem:[#allocation3 + $0x98] sm:$0xff]  ;;  %v78_v42 = vld [vmem:[#allocation3 + $0x110] sm:$0xff]  ;;  %v77_v46 = vld [vmem:[#allocation3 + $0x108] sm:$0xff] }
  0x15   :  { %130 = vmatpush.msra.mxu1 %v69_v21  ;;  %151 = vmatpush.msra.mxu2 %v84_v22  ;;  %v46_v43 = vld [vmem:[#allocation3 + $0x10] sm:$0xff]  ;;  %v45_v47 = vld [vmem:[#allocation3 + $0x8] sm:$0xff]  ;;  %v76_v49 = vld [vmem:[#allocation3 + $0x100] sm:$0xff] }
  0x16   :  { %111 = vmatpush.msra.mxu0 %v52_v23  ;;  %v62_v45 = vld [vmem:[#allocation3 + $0x90] sm:$0xff]  ;;  %v61_v48 = vld [vmem:[#allocation3 + $0x88] sm:$0xff]  ;;  %v44_v50 = vld [vmem:[#allocation3] sm:$0xff] }
  0x17   :  { %131 = vmatpush.msra.mxu1 %v68_v24  ;;  %152 = vmatpush.msra.mxu2 %v83_v25  ;;  %v60_v51 = vld [vmem:[#allocation3 + $0x80] sm:$0xff]  ;;  %v187_v55 = vld [vmem:[%s288_s3] ss:$0 sm:$0xff] }
  0x18   :  { %112 = vmatpush.msra.mxu0 %v51_v26  ;;  %v43_v44 = vld [vmem:[#allocation2] sm:$0x3f] }
  0x19   :  { %132 = vmatpush.msra.mxu1 %v67_v27  ;;  %153 = vmatpush.msra.mxu2 %v82_v30  ;;  %97 = vst [vmem:[#allocation1] ss:$4 sm:$0xff] %v43_v44 }
  0x1a   :  { %113 = vmatpush.msra.mxu0 %v50_v31 }
  0x1b   :  { %133 = vmatpush.msra.mxu1 %v66_v32  ;;  %154 = vmatpush.msra.mxu2 %v81_v33 }
  0x1c   :  { %114 = vmatpush.msra.mxu0 %v49_v34 }
  0x1d   :  { %134 = vmatpush.msra.mxu1 %v65_v35  ;;  %155 = vmatpush.msra.mxu2 %v80_v36 }
  0x1e   :  { %115 = vmatpush.msra.mxu0 %v48_v37 }
  0x1f   :  { %135 = vmatpush.msra.mxu1 %v64_v38  ;;  %156 = vmatpush.msra.mxu2 %v79_v39 }
  0x20   :  { %116 = vmatpush.msra.mxu0 %v47_v40  ;;  %v100_v52 = vld.sshfl [vmem:[#allocation1 + $0x10] sm:$0xff pattern:$0x73625140]  ;;  %v98_v53 = vld.sshfl [vmem:[#allocation1] sm:$0xff pattern:$0x73625140] }
  0x21   :  { %136 = vmatpush.msra.mxu1 %v63_v41  ;;  %157 = vmatpush.msra.mxu2 %v78_v42  ;;  %v99_v54 = vld.sshfl [vmem:[#allocation1 + $0x8] sm:$0xff pattern:$0x73625140] }
  0x22   :  { %117 = vmatpush.msra.mxu0 %v46_v43 }
  0x23   :  { %137 = vmatpush.msra.mxu1 %v62_v45  ;;  %158 = vmatpush.msra.mxu2 %v77_v46 }
  0x24   :  { %118 = vmatpush.msra.mxu0 %v45_v47 }
  0x25   :  { %138 = vmatpush.msra.mxu1 %v61_v48  ;;  %159 = vmatpush.msra.mxu2 %v76_v49 }
  0x26   :  { %119 = vmatpush.msra.mxu0 %v44_v50  ;;  %160 = vmatmul.f32.vlgmr.msra.gmra.mxu2 %v100_v52 }
  0x27   :  { %139 = vmatpush.msra.mxu1 %v60_v51  ;;  %120 = vmatmul.f32.vlgmr.msra.gmra.mxu0 %v98_v53 }
  0x28   :  { %140 = vmatmul.f32.vlgmr.msra.gmra.mxu1 %v99_v54 }
  0xa4   :  { %v121_v56 = vpop.f32.mrf.mxu0 }
  0xa5   :  { %v122_v57 = vadd.f32 %v187_v55, %v121_v56  ;;  %v141_v58 = vpop.f32.mrf.mxu1 }
  0xa7   :  { %v142_v59 = vadd.f32 %v141_v58, %v122_v57 }
  0xa9   :  { %v161_v60 = vpop.f32.mrf.mxu2 }
  0xaa   :  { %v162_v61 = vadd.f32 %v161_v60, %v142_v59 }
  0xac   :  { %164 = vst [vmem:[#allocation6] sm:$0x3] %v162_v61 }
  0xad   :  { %175 = dma.vmem_to_hbm [thread:$0]  %s171_s26, 32, %s173_s29, [#allocation5]  }
  0xae   :  { %238 = dma.done.wait [#allocation5], 32  }
  0xaf   :  { %239 = vsyncadd [#allocation5], 4294967264 }
  0xb0   :  { %180 = vsyncpa [#allocation4], 1 }
  0xb1   :  { %181 = vsyncpa [#allocation5], 1 }

</bundles_post_ra>
